<compile_context>
chip_gen: v5e
topology: v5e:2x2
jax: 0.10.0
libtpu: 0.0.40
codegen_flags: <defaults>
</compile_context>

<pallas_src>
import math
from typing import NamedTuple, Optional

import jax
import jax.numpy as jnp
from jax.experimental import pallas as pl
from jax.experimental.pallas import tpu as pltpu


# --------------------------------------------------------------------------- #
# Small helpers
# --------------------------------------------------------------------------- #
def _round_up(a: int, b: int) -> int:
    return ((a + b - 1) // b) * b


def _sublane(dtype) -> int:
    """Sublane packing multiple: 8 for 4-byte, 16 for 2-byte, 32 for 1-byte dtypes."""
    bits = jnp.dtype(dtype).itemsize * 8
    return max(8, 256 // bits)


def _pick_tile(dim_padded: int, target: int, align: int) -> int:
    """Largest multiple of `align` that divides `dim_padded` and is <= target."""
    t = max(align, min(target, dim_padded))
    t = (t // align) * align
    while dim_padded % t != 0:
        t -= align
    return t


def _vmem_limit_bytes(tile_bytes: int) -> int:
    """Scoped-VMEM limit: generous, but with headroom below physical capacity."""
    cap = 128 * 1024 * 1024
    try:
        info = pltpu.get_tpu_info()
        cap = int(getattr(info, "vmem_capacity_bytes", cap))
    except Exception:
        pass  # fall back to the conservative 128 MiB assumption
    headroom_cap = cap - 16 * 1024 * 1024           # v7x: 48 MiB; v5e/v6e: 112 MiB
    want = max(32 * 1024 * 1024, tile_bytes + 8 * 1024 * 1024)
    return int(max(16 * 1024 * 1024, min(want, headroom_cap, 100 * 1024 * 1024)))


# --------------------------------------------------------------------------- #
# Kernel
# --------------------------------------------------------------------------- #
def fused_linear_kernel(x_ref, w_ref, b_ref, o_ref, acc_ref):
    k = pl.program_id(2)

    @pl.when(k == 0)
    def _():
        # Initialize the accumulator with the (broadcast) bias: saves the separate
        # zero-fill and the full-tile VPU add in the store-heavy epilogue.
        acc_ref[...] = jnp.broadcast_to(
            b_ref[...].astype(jnp.float32), acc_ref.shape)

    # Single MXU matmul over this K tile, f32 accumulation in VMEM scratch.
    acc_ref[...] += jnp.dot(x_ref[...], w_ref[...],
                            preferred_element_type=jnp.float32)

    @pl.when(k == pl.num_programs(2) - 1)
    def _():
        o_ref[...] = acc_ref[...].astype(o_ref.dtype)


# --------------------------------------------------------------------------- #
# Parameter preparation (one-time, weight-stationary)
# --------------------------------------------------------------------------- #
class ParallelLinearParams(NamedTuple):
    w_t: jax.Array      # (K_pad, N_pad)  fused transposed weight, 128-aligned
    bias2d: jax.Array   # (1, N_pad)      f32 bias, 128-aligned
    in_features: int
    out_features: int


def prepare_parallel_linear_params(left_weight, right_weight, bias,
                                   compute_dtype: Optional[jnp.dtype] = None
                                   ) -> ParallelLinearParams:
    """One-time prep: concat transposed halves along K, pad K/N to 128 multiples.

    left_weight: (N, K_l), right_weight: (N, K_r), bias: (N,).
    compute_dtype: optional matmul dtype (e.g. jnp.bfloat16) for MXU-native compute;
    accumulation stays f32 inside the kernel.
    """
    n_dim = left_weight.shape[0]
    k_dim = left_weight.shape[1] + right_weight.shape[1]

    w_t = jnp.concatenate([left_weight.T, right_weight.T], axis=0)   # (K, N)
    if compute_dtype is not None:
        w_t = w_t.astype(compute_dtype)

    k_pad = _round_up(k_dim, 128)
    n_pad = _round_up(n_dim, 128)
    if (k_pad, n_pad) != (k_dim, n_dim):
        w_t = jnp.pad(w_t, ((0, k_pad - k_dim), (0, n_pad - n_dim)))

    bias2d = bias.astype(jnp.float32).reshape(1, -1)
    if n_pad != n_dim:
        bias2d = jnp.pad(bias2d, ((0, 0), (0, n_pad - n_dim)))

    return ParallelLinearParams(w_t, bias2d, k_dim, n_dim)


# --------------------------------------------------------------------------- #
# Hot path
# --------------------------------------------------------------------------- #
def parallel_linear_apply(x, params: ParallelLinearParams, *,
                          tm=512, tn=512, tk=1024):
    """x: (..., in_features) -> (..., out_features); weights already prepared."""
    lead_shape = x.shape[:-1]
    k_in = x.shape[-1]
    assert k_in == params.in_features, "x last dim must equal in_features"

    w_t, bias2d = params.w_t, params.bias2d
    k_pad, n_pad = w_t.shape
    n_out = params.out_features

    out_dtype = x.dtype
    cdtype = w_t.dtype
    if x.dtype != cdtype:
        x = x.astype(cdtype)

    m = math.prod(lead_shape) if lead_shape else 1
    x2d = x.reshape(m, k_in)

    # --- adaptive, alignment-aware tiles ----------------------------------- #
    sub = _sublane(cdtype)                       # 8 f32 / 16 bf16 / 32 int8
    tm_e = min(_round_up(tm, sub), _round_up(m, sub))
    m_p = _round_up(m, tm_e)

    tk_e = _pick_tile(k_pad, tk, 128)
    tn_e = _pick_tile(n_pad, tn, 128)

    # Keep >= 2 blocks on the parallel axes for small-M calls (v7x: 2 TCs/chip).
    if (m_p // tm_e) == 1 and (n_pad // tn_e) == 1 and n_pad >= 256:
        tn_e = _pick_tile(n_pad, n_pad // 2, 128)

    # Only the activation may need padding per call (weights padded in prepare).
    if (m_p, k_pad) != (m, k_in):
        x2d = jnp.pad(x2d, ((0, m_p - m), (0, k_pad - k_in)))

    grid = (m_p // tm_e, n_pad // tn_e, k_pad // tk_e)

    in_b = jnp.dtype(cdtype).itemsize
    out_b = jnp.dtype(out_dtype).itemsize
    tile_bytes = (2 * tm_e * tk_e * in_b          # double-buffered x tiles
                  + 2 * tk_e * tn_e * in_b        # double-buffered W tiles
                  + 2 * tm_e * tn_e * out_b       # double-buffered out tiles
                  + tm_e * tn_e * 4               # f32 accumulator
                  + 2 * tn_e * 4)                 # bias tiles

    cost = pl.CostEstimate(
        flops=2 * m_p * n_pad * k_pad,
        transcendentals=0,
        bytes_accessed=(m_p * k_pad + k_pad * n_pad) * in_b
                       + m_p * n_pad * out_b + n_pad * 4,
    )

    out = pl.pallas_call(
        fused_linear_kernel,
        out_shape=jax.ShapeDtypeStruct((m_p, n_pad), out_dtype),
        grid_spec=pltpu.PrefetchScalarGridSpec(
            num_scalar_prefetch=0,
            grid=grid,
            in_specs=[
                pl.BlockSpec((tm_e, tk_e), lambda i, j, k: (i, k)),   # x tile
                pl.BlockSpec((tk_e, tn_e), lambda i, j, k: (k, j)),   # fused W^T tile
                pl.BlockSpec((1, tn_e), lambda i, j, k: (0, j)),      # bias tile
            ],
            out_specs=pl.BlockSpec((tm_e, tn_e), lambda i, j, k: (i, j)),
            scratch_shapes=[pltpu.VMEM((tm_e, tn_e), jnp.float32)],
        ),
        compiler_params=pltpu.CompilerParams(
            dimension_semantics=("parallel", "parallel", "arbitrary"),
            vmem_limit_bytes=_vmem_limit_bytes(tile_bytes),
        ),
        cost_estimate=cost,
    )(x2d, w_t, bias2d)

    out = out[:m, :n_out]
    return out.reshape(*lead_shape, n_out)


def parallel_linear(x, left_weight, right_weight, bias, compute_dtype=None,
                    **tile_kwargs):
    """Convenience wrapper matching the module's forward exactly.

    For repeated inference, call `prepare_parallel_linear_params` once and reuse
    `parallel_linear_apply` (weight concat/transpose/pad hoisted off the hot path).
    """
    params = prepare_parallel_linear_params(left_weight, right_weight, bias,
                                            compute_dtype=compute_dtype)
    return parallel_linear_apply(x, params, **tile_kwargs)


# --------------------------------------------------------------------------- #
# Parameter init mirroring reset_parameters()
# --------------------------------------------------------------------------- #
def init_parallel_linear_params(key, in_features, out_features, dtype=jnp.float32):
    """kaiming_uniform_(a=sqrt(5)) per half => U(-1/sqrt(fan_in), 1/sqrt(fan_in));
    bias ~ U(-1/sqrt(fan_in_left), 1/sqrt(fan_in_left))."""
    k_left = in_features // 2
    k_right = in_features - k_left           # = in//2 + in%2
    k_wl, k_wr, k_b = jax.random.split(key, 3)

    bound_l = 1.0 / math.sqrt(k_left) if k_left > 0 else 0.0
    bound_r = 1.0 / math.sqrt(k_right) if k_right > 0 else 0.0
    left_weight = jax.random.uniform(
        k_wl, (out_features, k_left), dtype=dtype, minval=-bound_l, maxval=bound_l)
    right_weight = jax.random.uniform(
        k_wr, (out_features, k_right), dtype=dtype, minval=-bound_r, maxval=bound_r)

    bias_bound = 1.0 / math.sqrt(k_left) if k_left > 0 else 0.0
    bias = jax.random.uniform(
        k_b, (out_features,), dtype=dtype, minval=-bias_bound, maxval=bias_bound)
    return left_weight, right_weight, bias


# --------------------------------------------------------------------------- #
# Tests
# --------------------------------------------------------------------------- #
def _reference(x, lw, rw, b):
    k_left = lw.shape[1]
    return x[..., :k_left] @ lw.T + x[..., k_left:] @ rw.T + b


if __name__ == "__main__":
    key = jax.random.PRNGKey(0)

    # --- Test 1: small shape, single tile, default tiles -------------------- #
    k_x, k_p, key = jax.random.split(key, 3)
    batch, seq, in_features, out_features = 2, 8, 32, 32
    x = jax.random.normal(k_x, (batch, seq, in_features), dtype=jnp.float32)
    lw, rw, b = init_parallel_linear_params(k_p, in_features, out_features)

    params = prepare_parallel_linear_params(lw, rw, b)   # one-time, weight-stationary
    y = jax.block_until_ready(parallel_linear_apply(x, params))

    ref = _reference(x, lw, rw, b)
    assert y.shape == (batch, seq, out_features)
    assert jnp.allclose(y, ref, atol=2e-2, rtol=2e-2), "mismatch vs reference (small)"

    # --- Test 2: ragged / non-128-aligned shape, multi-tile K accumulation --- #
    k_x2, k_p2, key = jax.random.split(key, 3)
    batch2, seq2, in2, out2 = 3, 37, 201, 150            # odd split: left=100, right=101
    x2 = jax.random.normal(k_x2, (batch2, seq2, in2), dtype=jnp.float32)
    lw2, rw2, b2 = init_parallel_linear_params(k_p2, in2, out2)

    params2 = prepare_parallel_linear_params(lw2, rw2, b2)
    # Force small tiles so the grid has multiple blocks on every axis
    # (exercises k-accumulation, padding/slicing and output revisits).
    y2 = jax.block_until_ready(
        parallel_linear_apply(x2, params2, tm=32, tn=128, tk=128))

    ref2 = _reference(x2, lw2, rw2, b2)
    assert y2.shape == (batch2, seq2, out2)
    assert jnp.allclose(y2, ref2, atol=2e-2, rtol=2e-2), "mismatch vs reference (tiled)"

    print("KERNEL_OK")
</pallas_src>

<mosaic_0001>
module attributes {stable_mosaic.version = 11 : i64} {
  func.func @fused_linear_kernel(%arg0: i32, %arg1: i32, %arg2: i32, %arg3: memref<16x128xf32, #tpu.memory_space<vmem>>, %arg4: memref<128x128xf32, #tpu.memory_space<vmem>>, %arg5: memref<1x128xf32, #tpu.memory_space<vmem>>, %arg6: memref<16x128xf32, #tpu.memory_space<vmem>>, %arg7: memref<16x128xf32, #tpu.memory_space<vmem>>) attributes {dimension_semantics = [#tpu.dimension_semantics<parallel>, #tpu.dimension_semantics<parallel>, #tpu.dimension_semantics<arbitrary>], iteration_bounds = array<i64: 1, 1, 1>, scalar_prefetch = 0 : i64, scratch_operands = 1 : i64, tpu.core_type = #tpu.core_type<tc>, window_params = [{transform_indices = @transform_0, window_bounds = array<i64: 16, 128>}, {transform_indices = @transform_1, window_bounds = array<i64: 128, 128>}, {transform_indices = @transform_2, window_bounds = array<i64: 1, 128>}, {transform_indices = @transform_3, window_bounds = array<i64: 16, 128>}]} {
    %c0_i32 = arith.constant 0 : i32
    %0 = arith.cmpi eq, %arg2, %c0_i32 : i32
    %1 = arith.extui %0 : i1 to i32
    %c0_i32_0 = arith.constant 0 : i32
    %2 = arith.cmpi ne, %1, %c0_i32_0 : i32
    scf.if %2 {
      %c0_10 = arith.constant 0 : index
      %c0_11 = arith.constant 0 : index
      %12 = vector.load %arg5[%c0_10, %c0_11] : memref<1x128xf32, #tpu.memory_space<vmem>>, vector<1x128xf32>
      %13 = vector.shape_cast %12 : vector<1x128xf32> to vector<1x128xf32>
      %14 = vector.broadcast %13 : vector<1x128xf32> to vector<16x128xf32>
      %c0_12 = arith.constant 0 : index
      %c0_13 = arith.constant 0 : index
      %15 = vector.load %arg7[%c0_12, %c0_13] : memref<16x128xf32, #tpu.memory_space<vmem>>, vector<16x128xf32>
      tpu.vector_store %arg7[%c0_12, %c0_13], %14 {strides = array<i32>} : memref<16x128xf32, #tpu.memory_space<vmem>>, vector<16x128xf32>,
    } else {
    }
    %c0 = arith.constant 0 : index
    %c0_1 = arith.constant 0 : index
    %3 = vector.load %arg7[%c0, %c0_1] : memref<16x128xf32, #tpu.memory_space<vmem>>, vector<16x128xf32>
    %c0_2 = arith.constant 0 : index
    %c0_3 = arith.constant 0 : index
    %4 = vector.load %arg3[%c0_2, %c0_3] : memref<16x128xf32, #tpu.memory_space<vmem>>, vector<16x128xf32>
    %c0_4 = arith.constant 0 : index
    %c0_5 = arith.constant 0 : index
    %5 = vector.load %arg4[%c0_4, %c0_5] : memref<128x128xf32, #tpu.memory_space<vmem>>, vector<128x128xf32>
    %cst = arith.constant dense<0.000000e+00> : vector<16x128xf32>
    %6 = tpu.matmul %4, %5, %cst {dimension_numbers = #tpu.dot_dimension_numbers<[1], [0], [0], [1], [0, 0, 1, 1], [], []>} : vector<16x128xf32>, vector<128x128xf32>, vector<16x128xf32> -> vector<16x128xf32>
    %7 = arith.addf %3, %6 : vector<16x128xf32>
    %c0_6 = arith.constant 0 : index
    %c0_7 = arith.constant 0 : index
    %8 = vector.load %arg7[%c0_6, %c0_7] : memref<16x128xf32, #tpu.memory_space<vmem>>, vector<16x128xf32>
    tpu.vector_store %arg7[%c0_6, %c0_7], %7 {strides = array<i32>} : memref<16x128xf32, #tpu.memory_space<vmem>>, vector<16x128xf32>,
    %c0_i32_8 = arith.constant 0 : i32
    %9 = arith.cmpi eq, %arg2, %c0_i32_8 : i32
    %10 = arith.extui %9 : i1 to i32
    %c0_i32_9 = arith.constant 0 : i32
    %11 = arith.cmpi ne, %10, %c0_i32_9 : i32
    scf.if %11 {
      %c0_10 = arith.constant 0 : index
      %c0_11 = arith.constant 0 : index
      %12 = vector.load %arg7[%c0_10, %c0_11] : memref<16x128xf32, #tpu.memory_space<vmem>>, vector<16x128xf32>
      %c0_12 = arith.constant 0 : index
      %c0_13 = arith.constant 0 : index
      %13 = vector.load %arg6[%c0_12, %c0_13] : memref<16x128xf32, #tpu.memory_space<vmem>>, vector<16x128xf32>
      tpu.vector_store %arg6[%c0_12, %c0_13], %12 {strides = array<i32>} : memref<16x128xf32, #tpu.memory_space<vmem>>, vector<16x128xf32>,
    } else {
    }
    return
  }
  func.func @transform_0(%arg0: i32, %arg1: i32, %arg2: i32) -> (i32, i32) {
    %c0_i32 = arith.constant 0 : i32
    return %arg0, %arg2 : i32, i32
  }
  func.func @transform_1(%arg0: i32, %arg1: i32, %arg2: i32) -> (i32, i32) {
    %c0_i32 = arith.constant 0 : i32
    return %arg2, %arg1 : i32, i32
  }
  func.func @transform_2(%arg0: i32, %arg1: i32, %arg2: i32) -> (i32, i32) {
    %c0_i32 = arith.constant 0 : i32
    %c0_i32_0 = arith.constant 0 : i32
    return %c0_i32, %arg1 : i32, i32
  }
  func.func @transform_3(%arg0: i32, %arg1: i32, %arg2: i32) -> (i32, i32) {
    %c0_i32 = arith.constant 0 : i32
    return %arg0, %arg1 : i32, i32
  }
}

</mosaic_0001>

<bundles_post_ra>
// kernel: tpu_custom_call.1
= control target key start
LH: loop header
LB: loop body
LE: loop exit
PB: predicated region body
PF: predicated region fallthrough
CT: control target
= control target key end

     0   :  { %8 = vsyncpa [#allocation4], 0  ;;  %s277_s0 = inlined_call_operand.hbm [shape: f32[16,128], index: 0, kind: input, shape index: {}]   ;;  %s278_s1 = inlined_call_operand.hbm [shape: f32[128,128], index: 1, kind: input, shape index: {}]   ;;  %s279_s2 = inlined_call_operand.vmem [shape: f32[1,128], index: 2, kind: input, shape index: {}]   ;;  %s280_s3 = inlined_call_operand.hbm [shape: f32[16,128], index: 3, kind: output, shape index: {}]  }
   0x1   :  { %9 = vsyncpa [#allocation7], 0 }
   0x2   :  { %10 = vsyncpa [#allocation5], 0  ;;  %s15_s14 = sshll.u32 %s277_s0, 4  ;;  %s231_s15 = smov [#allocation3]   ;;  %s16_s14 = int_to_ptr.hbm [resolvable:$true] %s15_s14 }
   0x3   :  { %s17_s16 = sshll.u32 %s231_s15, 4  ;;  %s28_s19 = sshll.u32 %s278_s1, 4  ;;  %s18_s16 = int_to_ptr.vmem [resolvable:$true] %s17_s16  ;;  %s29_s19 = int_to_ptr.hbm [resolvable:$true] %s28_s19 }
   0x4   :  { %s232_s20 = smov 128   ;;  %s233_s21 = smov 8  }
   0x5   :  { %23 = dma.hbm_to_vmem [thread:$0]  %s16_s14, 256, %s18_s16, [#allocation4], %s232_s20, %s232_s20, %s233_s21  }
   0x6   :  { %s234_s22 = smov [#allocation6]  }
   0x7   :  { %s30_s23 = sshll.u32 %s234_s22, 4  ;;  %s31_s23 = int_to_ptr.vmem [resolvable:$true] %s30_s23 }
   0x8   :  { %36 = dma.hbm_to_vmem [thread:$0]  %s29_s19, 2048, %s31_s23, [#allocation7], %s232_s20, %s232_s20, %s233_s21  }
   0x9   :  { %225 = dma.done.wait [#allocation4], 256  }
   0xa   :  { %226 = vsyncadd [#allocation4], 4294967040 }
   0xb   :  { %227 = dma.done.wait [#allocation7], 2048  }
   0xc   :  { %228 = vsyncadd [#allocation7], 4294965248  ;;  %v76_v0 = vld [vmem:[#allocation6 + $0x78] sm:$0xff]  ;;  %v75_v1 = vld [vmem:[#allocation6 + $0x70] sm:$0xff]  ;;  %s235_s24 = smov [#allocation8]   ;;  %s117_s28 = sshll.u32 %s280_s3, 4  ;;  %s118_s28 = int_to_ptr.hbm [resolvable:$true] %s117_s28 }
   0xd   :  { %77 = vmatpush.msra.mxu0 %v76_v0  ;;  %131 = vmatpush.msra.mxu1 %v76_v0  ;;  %v74_v2 = vld [vmem:[#allocation6 + $0x68] sm:$0xff]  ;;  %v73_v3 = vld [vmem:[#allocation6 + $0x60] sm:$0xff]  ;;  %v72_v4 = vld [vmem:[#allocation6 + $0x58] sm:$0xff]  ;;  %s115_s25 = sshll.u32 %s235_s24, 4  ;;  %s116_s25 = int_to_ptr.vmem [resolvable:$true] %s115_s25 }
   0xe   :  { %v71_v5 = vld [vmem:[#allocation6 + $0x50] sm:$0xff]  ;;  %v70_v6 = vld [vmem:[#allocation6 + $0x48] sm:$0xff]  ;;  %v69_v7 = vld [vmem:[#allocation6 + $0x40] sm:$0xff] }
   0xf   :  { %78 = vmatpush.msra.mxu0 %v75_v1  ;;  %132 = vmatpush.msra.mxu1 %v75_v1  ;;  %v68_v8 = vld [vmem:[#allocation6 + $0x38] sm:$0xff]  ;;  %v67_v9 = vld [vmem:[#allocation6 + $0x30] sm:$0xff]  ;;  %v66_v10 = vld [vmem:[#allocation6 + $0x28] sm:$0xff] }
  0x10   :  { %v65_v11 = vld [vmem:[#allocation6 + $0x20] sm:$0xff]  ;;  %v64_v12 = vld [vmem:[#allocation6 + $0x18] sm:$0xff]  ;;  %v63_v13 = vld [vmem:[#allocation6 + $0x10] sm:$0xff] }
  0x11   :  { %79 = vmatpush.msra.mxu0 %v74_v2  ;;  %133 = vmatpush.msra.mxu1 %v74_v2  ;;  %v62_v14 = vld [vmem:[#allocation6 + $0x8] sm:$0xff]  ;;  %v61_v15 = vld [vmem:[#allocation6] sm:$0xff]  ;;  %v59_v16 = vld [vmem:[#allocation3] sm:$0xff] }
  0x12   :  { %v60_v17 = vld [vmem:[#allocation3 + $0x8] sm:$0xff]  ;;  %v152_v18 = vld [vmem:[%s279_s2] ss:$0 sm:$0xff] }
  0x13   :  { %80 = vmatpush.msra.mxu0 %v73_v3  ;;  %134 = vmatpush.msra.mxu1 %v73_v3 }
  0x15   :  { %81 = vmatpush.msra.mxu0 %v72_v4  ;;  %135 = vmatpush.msra.mxu1 %v72_v4 }
  0x17   :  { %82 = vmatpush.msra.mxu0 %v71_v5  ;;  %136 = vmatpush.msra.mxu1 %v71_v5 }
  0x19   :  { %83 = vmatpush.msra.mxu0 %v70_v6  ;;  %137 = vmatpush.msra.mxu1 %v70_v6 }
  0x1b   :  { %84 = vmatpush.msra.mxu0 %v69_v7  ;;  %138 = vmatpush.msra.mxu1 %v69_v7 }
  0x1d   :  { %85 = vmatpush.msra.mxu0 %v68_v8  ;;  %139 = vmatpush.msra.mxu1 %v68_v8 }
  0x1f   :  { %86 = vmatpush.msra.mxu0 %v67_v9  ;;  %140 = vmatpush.msra.mxu1 %v67_v9 }
  0x21   :  { %87 = vmatpush.msra.mxu0 %v66_v10  ;;  %141 = vmatpush.msra.mxu1 %v66_v10 }
  0x23   :  { %88 = vmatpush.msra.mxu0 %v65_v11  ;;  %142 = vmatpush.msra.mxu1 %v65_v11 }
  0x25   :  { %89 = vmatpush.msra.mxu0 %v64_v12  ;;  %143 = vmatpush.msra.mxu1 %v64_v12 }
  0x27   :  { %90 = vmatpush.msra.mxu0 %v63_v13  ;;  %144 = vmatpush.msra.mxu1 %v63_v13 }
  0x29   :  { %91 = vmatpush.msra.mxu0 %v62_v14  ;;  %145 = vmatpush.msra.mxu1 %v62_v14 }
  0x2b   :  { %92 = vmatpush.msra.mxu0 %v61_v15  ;;  %146 = vmatpush.msra.mxu1 %v61_v15 }
  0x2c   :  { %93 = vmatmul.f32.vlgmr.msra.gmra.mxu0 %v59_v16  ;;  %96 = vmatmul.f32.vlgmr.msra.gmra.mxu1 %v60_v17 }
  0xa9   :  { %v94_v19 = vpop.f32.mrf.mxu0  ;;  %v97_v20 = vpop.f32.mrf.mxu1 }
  0xaa   :  { %v100_v21 = vadd.f32 %v152_v18, %v94_v19  ;;  %v101_v22 = vadd.f32 %v152_v18, %v97_v20 }
  0xac   :  { %109 = vst [vmem:[#allocation8] sm:$0xff] %v100_v21 }
  0xad   :  { %110 = vst [vmem:[#allocation8 + $0x8] sm:$0xff] %v101_v22 }
  0xae   :  { %123 = dma.vmem_to_hbm [thread:$0]  %s116_s25, 256, %s118_s28, [#allocation5], %s232_s20, %s232_s20, %s233_s21  }
  0xaf   :  { %229 = dma.done.wait [#allocation5], 256  }
  0xb0   :  { %230 = vsyncadd [#allocation5], 4294967040 }
  0xb1   :  { %128 = vsyncpa [#allocation4], 1 }
  0xb2   :  { %129 = vsyncpa [#allocation7], 1 }
  0xb3   :  { %130 = vsyncpa [#allocation5], 1 }

</bundles_post_ra>
